<compile_context>
chip_gen: v6e
topology: v6e:2x2x1
jax: 0.10.0
libtpu: 0.0.40
codegen_flags: <defaults>
</compile_context>

<pallas_src>
import math

import jax
import jax.numpy as jnp
from jax.experimental import pallas as pl
from jax.experimental.pallas import tpu as pltpu

_LANE = 128
_SUBLANE = 8


def _round_up(x, m):
    return ((x + m - 1) // m) * m


def _vivqa_kernel(text_ref, img_ref,
                  w_tp_ref, b_tp_ref,
                  w_ip_ref, b_ip_ref,
                  w_fc_img_ref, w_fc_txt_ref, b_fc_ref,
                  w_cl_ref, b_cl_ref,
                  out_ref, acc_ref):
    k = pl.program_id(1)

    @pl.when(k == 0)
    def _init():
        acc_ref[...] = jnp.zeros_like(acc_ref)

    # ImageEncoder.proj matmul, streamed over the (potentially huge) features_dim.
    acc_ref[...] += jnp.dot(img_ref[...], w_ip_ref[...],
                            preferred_element_type=jnp.float32)

    @pl.when(k == pl.num_programs(1) - 1)
    def _finalize():
        w_dtype = w_fc_img_ref.dtype
        # ImageEncoder.proj bias + ReLU
        img_f = jnp.maximum(acc_ref[...] + b_ip_ref[...], 0.0)
        # TextEncoder.proj: Linear + ReLU (text hidden is small -> single pass)
        text_f = jnp.maximum(
            jnp.dot(text_ref[...], w_tp_ref[...],
                    preferred_element_type=jnp.float32) + b_tp_ref[...],
            0.0)
        # Classifier.fc on cat((img_f, text_f), dim=1): the concat is expressed
        # as a split-weight sum of two matmuls (img half first, text half
        # second), so no lane shuffle is needed.  Dropout == identity in eval.
        h = (jnp.dot(img_f.astype(w_dtype), w_fc_img_ref[...],
                     preferred_element_type=jnp.float32)
             + jnp.dot(text_f.astype(w_dtype), w_fc_txt_ref[...],
                       preferred_element_type=jnp.float32)
             + b_fc_ref[...])
        h = jnp.maximum(h, 0.0)
        # Classifier.classifier
        out_ref[...] = (jnp.dot(h.astype(w_cl_ref.dtype), w_cl_ref[...],
                                preferred_element_type=jnp.float32)
                        + b_cl_ref[...]).astype(out_ref.dtype)


def prepare_params(params, compute_dtype=jnp.float32):
    """One-time parameter prep (do NOT run per call).

    Transposes PyTorch (out, in) weights to (in, out), splits the fc weight at
    the concat boundary, zero-pads every feature dim up to a multiple of 128
    lanes and casts weights to `compute_dtype` (use jnp.bfloat16 at
    production sizes; biases stay f32 for the f32 accumulators)."""
    w_tp, b_tp, w_ip, b_ip, w_fc, b_fc, w_cl, b_cl = params
    proj, text_hidden = w_tp.shape
    features_dim = w_ip.shape[1]
    hidden = w_fc.shape[0]
    answers = w_cl.shape[0]

    t_pad = _round_up(text_hidden, _LANE)
    f_pad = _round_up(features_dim, _LANE)
    p_pad = _round_up(proj, _LANE)
    h_pad = _round_up(hidden, _LANE)
    a_pad = _round_up(answers, _LANE)

    def pad2(w, rows, cols):
        return jnp.pad(w, ((0, rows - w.shape[0]), (0, cols - w.shape[1])))

    def pad_b(b, cols):
        return jnp.pad(b, (0, cols - b.shape[0])).reshape(1, cols)

    w_fc_t = w_fc.T  # (2*proj, hidden); rows [:proj] hit img_f, [proj:] hit text_f

    return {
        "w_tp": pad2(w_tp.T, t_pad, p_pad).astype(compute_dtype),
        "b_tp": pad_b(b_tp, p_pad).astype(jnp.float32),
        "w_ip": pad2(w_ip.T, f_pad, p_pad).astype(compute_dtype),
        "b_ip": pad_b(b_ip, p_pad).astype(jnp.float32),
        "w_fc_img": pad2(w_fc_t[:proj], p_pad, h_pad).astype(compute_dtype),
        "w_fc_txt": pad2(w_fc_t[proj:], p_pad, h_pad).astype(compute_dtype),
        "b_fc": pad_b(b_fc, h_pad).astype(jnp.float32),
        "w_cl": pad2(w_cl.T, h_pad, a_pad).astype(compute_dtype),
        "b_cl": pad_b(b_cl, a_pad).astype(jnp.float32),
        "dims": dict(text_hidden=text_hidden, features_dim=features_dim,
                     answers=answers, t_pad=t_pad, f_pad=f_pad,
                     p_pad=p_pad, h_pad=h_pad, a_pad=a_pad),
    }


def vivqa_forward(text_cls, img_feat, prepped, *, tm=128, tk=512):
    """Fused projection/classifier head as a single tiled Pallas kernel."""
    d = prepped["dims"]
    B = text_cls.shape[0]
    compute_dtype = prepped["w_tp"].dtype

    # Batch tile: multiple of 8 sublanes, capped at `tm`.
    tm = max(_SUBLANE, min(_round_up(B, _SUBLANE), _round_up(tm, _SUBLANE)))
    b_pad = _round_up(B, tm)

    # K tile for the img projection: a multiple of 128 that divides f_pad.
    f_blocks = d["f_pad"] // _LANE
    tk = _LANE * math.gcd(f_blocks, max(tk // _LANE, 1))
    nk = d["f_pad"] // tk

    # Per-call zero-padding of the (small) activations up to tileable shapes.
    text_in = jnp.pad(text_cls.astype(compute_dtype),
                      ((0, b_pad - B), (0, d["t_pad"] - text_cls.shape[1])))
    img_in = jnp.pad(img_feat.astype(compute_dtype),
                     ((0, b_pad - B), (0, d["f_pad"] - img_feat.shape[1])))

    grid = (b_pad // tm, nk)

    def fixed(i, k):
        return (0, 0)

    in_specs = [
        pl.BlockSpec((tm, d["t_pad"]), lambda i, k: (i, 0)),     # text_cls
        pl.BlockSpec((tm, tk), lambda i, k: (i, k)),             # img_feat (K-tiled)
        pl.BlockSpec((d["t_pad"], d["p_pad"]), fixed),           # w_tp
        pl.BlockSpec((1, d["p_pad"]), fixed),                    # b_tp
        pl.BlockSpec((tk, d["p_pad"]), lambda i, k: (k, 0)),     # w_ip (K-tiled stream)
        pl.BlockSpec((1, d["p_pad"]), fixed),                    # b_ip
        pl.BlockSpec((d["p_pad"], d["h_pad"]), fixed),           # w_fc (img half)
        pl.BlockSpec((d["p_pad"], d["h_pad"]), fixed),           # w_fc (text half)
        pl.BlockSpec((1, d["h_pad"]), fixed),                    # b_fc
        pl.BlockSpec((d["h_pad"], d["a_pad"]), fixed),           # w_cl
        pl.BlockSpec((1, d["a_pad"]), fixed),                    # b_cl
    ]

    out = pl.pallas_call(
        _vivqa_kernel,
        out_shape=jax.ShapeDtypeStruct((b_pad, d["a_pad"]), jnp.float32),
        grid_spec=pltpu.PrefetchScalarGridSpec(
            num_scalar_prefetch=0,
            grid=grid,
            in_specs=in_specs,
            out_specs=pl.BlockSpec((tm, d["a_pad"]), lambda i, k: (i, 0)),
            scratch_shapes=[pltpu.VMEM((tm, d["p_pad"]), jnp.float32)],
        ),
        compiler_params=pltpu.CompilerParams(
            dimension_semantics=("parallel", "arbitrary"),
            vmem_limit_bytes=32 * 1024 * 1024,
        ),
    )(text_in, img_in,
      prepped["w_tp"], prepped["b_tp"],
      prepped["w_ip"], prepped["b_ip"],
      prepped["w_fc_img"], prepped["w_fc_txt"], prepped["b_fc"],
      prepped["w_cl"], prepped["b_cl"])

    # Strip batch/lane padding (padded logit columns are just the zero bias).
    return out[:B, :d["answers"]]


def _init_linear(key, out_dim, in_dim):
    """Deterministic PyTorch-style Linear init: U(-1/sqrt(fan_in), 1/sqrt(fan_in))."""
    kw, kb = jax.random.split(key)
    bound = 1.0 / jnp.sqrt(jnp.float32(in_dim))
    w = jax.random.uniform(kw, (out_dim, in_dim), jnp.float32, -bound, bound)
    b = jax.random.uniform(kb, (out_dim,), jnp.float32, -bound, bound)
    return w, b


def get_threshold_linear(current_epoch=0, total_epochs=100,
                         start_threshold=0.6, min_threshold=0.0,
                         use_dynamic_thresh=True, text_para_thresh=0.6):
    # Pure scalar bookkeeping from ViVQAModel.get_threshold_linear (no tensor compute).
    if not use_dynamic_thresh:
        return text_para_thresh
    decay = (start_threshold - min_threshold) * (current_epoch / total_epochs)
    return max(start_threshold - decay, min_threshold)


if __name__ == "__main__":
    # Small shapes consistent with the module's forward:
    B = 8                 # batch
    TEXT_HIDDEN = 32      # text_model.config.hidden_size
    FEATURES_DIM = 64     # img_encoder_dict['features_dim'] (flattened resnet features)
    PROJ = 32             # projection_dim
    HIDDEN = 32           # hidden_dim
    ANSWERS = 16          # answer_space_len

    root = jax.random.PRNGKey(0)
    k_in_t, k_in_i, k_tp, k_ip, k_fc, k_cl = jax.random.split(root, 6)

    # Kernel inputs = backbone pooled features (see TODO(synk) above).
    text_cls = jax.random.normal(k_in_t, (B, TEXT_HIDDEN), jnp.float32)   # last_hidden_state[:, 0, :]
    img_feat = jax.random.normal(k_in_i, (B, FEATURES_DIM), jnp.float32)  # resnet features, flattened

    # Deterministic parameter init (module __init__ shapes).
    w_tp, b_tp = _init_linear(k_tp, PROJ, TEXT_HIDDEN)       # TextEncoder.proj[0]
    w_ip, b_ip = _init_linear(k_ip, PROJ, FEATURES_DIM)      # ImageEncoder.proj[0]
    w_fc, b_fc = _init_linear(k_fc, HIDDEN, PROJ * 2)        # Classifier.fc
    w_cl, b_cl = _init_linear(k_cl, ANSWERS, HIDDEN)         # Classifier.classifier
    params = (w_tp, b_tp, w_ip, b_ip, w_fc, b_fc, w_cl, b_cl)

    # One-time prep (transpose/split/pad/cast) — NOT in the per-call path.
    # Use compute_dtype=jnp.bfloat16 at production sizes (loosen tolerances).
    prepped = jax.tree_util.tree_map(
        jax.block_until_ready, prepare_params(params, compute_dtype=jnp.float32))

    _ = get_threshold_linear()  # mirrors forward's threshold computation (unused in eval path)

    logits = vivqa_forward(text_cls, img_feat, prepped)
    logits = jax.block_until_ready(logits)

    # Pure-JAX reference of the same eval-mode forward.
    text_f_ref = jnp.maximum(text_cls @ w_tp.T + b_tp, 0.0)
    img_f_ref = jnp.maximum(img_feat @ w_ip.T + b_ip, 0.0)
    x_ref = jnp.concatenate([img_f_ref, text_f_ref], axis=1)
    h_ref = jnp.maximum(x_ref @ w_fc.T + b_fc, 0.0)
    logits_ref = h_ref @ w_cl.T + b_cl

    assert logits.shape == (B, ANSWERS)
    assert jnp.allclose(logits, logits_ref, atol=1e-5, rtol=1e-5)
    print("KERNEL_OK")
</pallas_src>

<mosaic_0001>
module attributes {stable_mosaic.version = 11 : i64} {
  func.func @_vivqa_kernel(%arg0: i32, %arg1: i32, %arg2: memref<8x128xf32, #tpu.memory_space<vmem>>, %arg3: memref<8x128xf32, #tpu.memory_space<vmem>>, %arg4: memref<128x128xf32, #tpu.memory_space<vmem>>, %arg5: memref<1x128xf32, #tpu.memory_space<vmem>>, %arg6: memref<128x128xf32, #tpu.memory_space<vmem>>, %arg7: memref<1x128xf32, #tpu.memory_space<vmem>>, %arg8: memref<128x128xf32, #tpu.memory_space<vmem>>, %arg9: memref<128x128xf32, #tpu.memory_space<vmem>>, %arg10: memref<1x128xf32, #tpu.memory_space<vmem>>, %arg11: memref<128x128xf32, #tpu.memory_space<vmem>>, %arg12: memref<1x128xf32, #tpu.memory_space<vmem>>, %arg13: memref<8x128xf32, #tpu.memory_space<vmem>>, %arg14: memref<8x128xf32, #tpu.memory_space<vmem>>) attributes {dimension_semantics = [#tpu.dimension_semantics<parallel>, #tpu.dimension_semantics<arbitrary>], iteration_bounds = array<i64: 1, 1>, scalar_prefetch = 0 : i64, scratch_operands = 1 : i64, tpu.core_type = #tpu.core_type<tc>, window_params = [{transform_indices = @transform_0, window_bounds = array<i64: 8, 128>}, {transform_indices = @transform_1, window_bounds = array<i64: 8, 128>}, {pipeline_mode = #tpu.pipeline_mode<synchronous>, transform_indices = @transform_2, window_bounds = array<i64: 128, 128>}, {pipeline_mode = #tpu.pipeline_mode<synchronous>, transform_indices = @transform_3, window_bounds = array<i64: 1, 128>}, {transform_indices = @transform_4, window_bounds = array<i64: 128, 128>}, {pipeline_mode = #tpu.pipeline_mode<synchronous>, transform_indices = @transform_5, window_bounds = array<i64: 1, 128>}, {pipeline_mode = #tpu.pipeline_mode<synchronous>, transform_indices = @transform_6, window_bounds = array<i64: 128, 128>}, {pipeline_mode = #tpu.pipeline_mode<synchronous>, transform_indices = @transform_7, window_bounds = array<i64: 128, 128>}, {pipeline_mode = #tpu.pipeline_mode<synchronous>, transform_indices = @transform_8, window_bounds = array<i64: 1, 128>}, {pipeline_mode = #tpu.pipeline_mode<synchronous>, transform_indices = @transform_9, window_bounds = array<i64: 128, 128>}, {pipeline_mode = #tpu.pipeline_mode<synchronous>, transform_indices = @transform_10, window_bounds = array<i64: 1, 128>}, {transform_indices = @transform_11, window_bounds = array<i64: 8, 128>}]} {
    %c0_i32 = arith.constant 0 : i32
    %0 = arith.cmpi eq, %arg1, %c0_i32 : i32
    %1 = arith.extui %0 : i1 to i32
    %c0_i32_0 = arith.constant 0 : i32
    %2 = arith.cmpi ne, %1, %c0_i32_0 : i32
    scf.if %2 {
      %cst_10 = arith.constant 0.000000e+00 : f32
      %12 = vector.broadcast %cst_10 : f32 to vector<8x128xf32>
      %c0_11 = arith.constant 0 : index
      %c0_12 = arith.constant 0 : index
      %13 = vector.load %arg14[%c0_11, %c0_12] : memref<8x128xf32, #tpu.memory_space<vmem>>, vector<8x128xf32>
      tpu.vector_store %arg14[%c0_11, %c0_12], %12 {strides = array<i32>} : memref<8x128xf32, #tpu.memory_space<vmem>>, vector<8x128xf32>,
    } else {
    }
    %c0 = arith.constant 0 : index
    %c0_1 = arith.constant 0 : index
    %3 = vector.load %arg14[%c0, %c0_1] : memref<8x128xf32, #tpu.memory_space<vmem>>, vector<8x128xf32>
    %c0_2 = arith.constant 0 : index
    %c0_3 = arith.constant 0 : index
    %4 = vector.load %arg3[%c0_2, %c0_3] : memref<8x128xf32, #tpu.memory_space<vmem>>, vector<8x128xf32>
    %c0_4 = arith.constant 0 : index
    %c0_5 = arith.constant 0 : index
    %5 = vector.load %arg6[%c0_4, %c0_5] : memref<128x128xf32, #tpu.memory_space<vmem>>, vector<128x128xf32>
    %cst = arith.constant dense<0.000000e+00> : vector<8x128xf32>
    %6 = tpu.matmul %4, %5, %cst {dimension_numbers = #tpu.dot_dimension_numbers<[1], [0], [0], [1], [0, 0, 1, 1], [], []>} : vector<8x128xf32>, vector<128x128xf32>, vector<8x128xf32> -> vector<8x128xf32>
    %7 = arith.addf %3, %6 : vector<8x128xf32>
    %c0_6 = arith.constant 0 : index
    %c0_7 = arith.constant 0 : index
    %8 = vector.load %arg14[%c0_6, %c0_7] : memref<8x128xf32, #tpu.memory_space<vmem>>, vector<8x128xf32>
    tpu.vector_store %arg14[%c0_6, %c0_7], %7 {strides = array<i32>} : memref<8x128xf32, #tpu.memory_space<vmem>>, vector<8x128xf32>,
    %c0_i32_8 = arith.constant 0 : i32
    %9 = arith.cmpi eq, %arg1, %c0_i32_8 : i32
    %10 = arith.extui %9 : i1 to i32
    %c0_i32_9 = arith.constant 0 : i32
    %11 = arith.cmpi ne, %10, %c0_i32_9 : i32
    scf.if %11 {
      %c0_10 = arith.constant 0 : index
      %c0_11 = arith.constant 0 : index
      %12 = vector.load %arg14[%c0_10, %c0_11] : memref<8x128xf32, #tpu.memory_space<vmem>>, vector<8x128xf32>
      %c0_12 = arith.constant 0 : index
      %c0_13 = arith.constant 0 : index
      %13 = vector.load %arg7[%c0_12, %c0_13] : memref<1x128xf32, #tpu.memory_space<vmem>>, vector<1x128xf32>
      %14 = vector.broadcast %13 : vector<1x128xf32> to vector<8x128xf32>
      %15 = arith.addf %12, %14 : vector<8x128xf32>
      %cst_14 = arith.constant 0.000000e+00 : f32
      %16 = vector.broadcast %cst_14 : f32 to vector<8x128xf32>
      %17 = arith.maximumf %15, %16 : vector<8x128xf32>
      %c0_15 = arith.constant 0 : index
      %c0_16 = arith.constant 0 : index
      %18 = vector.load %arg2[%c0_15, %c0_16] : memref<8x128xf32, #tpu.memory_space<vmem>>, vector<8x128xf32>
      %c0_17 = arith.constant 0 : index
      %c0_18 = arith.constant 0 : index
      %19 = vector.load %arg4[%c0_17, %c0_18] : memref<128x128xf32, #tpu.memory_space<vmem>>, vector<128x128xf32>
      %cst_19 = arith.constant dense<0.000000e+00> : vector<8x128xf32>
      %20 = tpu.matmul %18, %19, %cst_19 {dimension_numbers = #tpu.dot_dimension_numbers<[1], [0], [0], [1], [0, 0, 1, 1], [], []>} : vector<8x128xf32>, vector<128x128xf32>, vector<8x128xf32> -> vector<8x128xf32>
      %c0_20 = arith.constant 0 : index
      %c0_21 = arith.constant 0 : index
      %21 = vector.load %arg5[%c0_20, %c0_21] : memref<1x128xf32, #tpu.memory_space<vmem>>, vector<1x128xf32>
      %22 = vector.broadcast %21 : vector<1x128xf32> to vector<8x128xf32>
      %23 = arith.addf %20, %22 : vector<8x128xf32>
      %cst_22 = arith.constant 0.000000e+00 : f32
      %24 = vector.broadcast %cst_22 : f32 to vector<8x128xf32>
      %25 = arith.maximumf %23, %24 : vector<8x128xf32>
      %c0_23 = arith.constant 0 : index
      %c0_24 = arith.constant 0 : index
      %26 = vector.load %arg8[%c0_23, %c0_24] : memref<128x128xf32, #tpu.memory_space<vmem>>, vector<128x128xf32>
      %cst_25 = arith.constant dense<0.000000e+00> : vector<8x128xf32>
      %27 = tpu.matmul %17, %26, %cst_25 {dimension_numbers = #tpu.dot_dimension_numbers<[1], [0], [0], [1], [0, 0, 1, 1], [], []>} : vector<8x128xf32>, vector<128x128xf32>, vector<8x128xf32> -> vector<8x128xf32>
      %c0_26 = arith.constant 0 : index
      %c0_27 = arith.constant 0 : index
      %28 = vector.load %arg9[%c0_26, %c0_27] : memref<128x128xf32, #tpu.memory_space<vmem>>, vector<128x128xf32>
      %cst_28 = arith.constant dense<0.000000e+00> : vector<8x128xf32>
      %29 = tpu.matmul %25, %28, %cst_28 {dimension_numbers = #tpu.dot_dimension_numbers<[1], [0], [0], [1], [0, 0, 1, 1], [], []>} : vector<8x128xf32>, vector<128x128xf32>, vector<8x128xf32> -> vector<8x128xf32>
      %30 = arith.addf %27, %29 : vector<8x128xf32>
      %c0_29 = arith.constant 0 : index
      %c0_30 = arith.constant 0 : index
      %31 = vector.load %arg10[%c0_29, %c0_30] : memref<1x128xf32, #tpu.memory_space<vmem>>, vector<1x128xf32>
      %32 = vector.broadcast %31 : vector<1x128xf32> to vector<8x128xf32>
      %33 = arith.addf %30, %32 : vector<8x128xf32>
      %cst_31 = arith.constant 0.000000e+00 : f32
      %34 = vector.broadcast %cst_31 : f32 to vector<8x128xf32>
      %35 = arith.maximumf %33, %34 : vector<8x128xf32>
      %c0_32 = arith.constant 0 : index
      %c0_33 = arith.constant 0 : index
      %36 = vector.load %arg11[%c0_32, %c0_33] : memref<128x128xf32, #tpu.memory_space<vmem>>, vector<128x128xf32>
      %cst_34 = arith.constant dense<0.000000e+00> : vector<8x128xf32>
      %37 = tpu.matmul %35, %36, %cst_34 {dimension_numbers = #tpu.dot_dimension_numbers<[1], [0], [0], [1], [0, 0, 1, 1], [], []>} : vector<8x128xf32>, vector<128x128xf32>, vector<8x128xf32> -> vector<8x128xf32>
      %c0_35 = arith.constant 0 : index
      %c0_36 = arith.constant 0 : index
      %38 = vector.load %arg12[%c0_35, %c0_36] : memref<1x128xf32, #tpu.memory_space<vmem>>, vector<1x128xf32>
      %39 = vector.broadcast %38 : vector<1x128xf32> to vector<8x128xf32>
      %40 = arith.addf %37, %39 : vector<8x128xf32>
      %c0_37 = arith.constant 0 : index
      %c0_38 = arith.constant 0 : index
      %41 = vector.load %arg13[%c0_37, %c0_38] : memref<8x128xf32, #tpu.memory_space<vmem>>, vector<8x128xf32>
      tpu.vector_store %arg13[%c0_37, %c0_38], %40 {strides = array<i32>} : memref<8x128xf32, #tpu.memory_space<vmem>>, vector<8x128xf32>,
    } else {
    }
    return
  }
  func.func @transform_0(%arg0: i32, %arg1: i32) -> (i32, i32) {
    %c0_i32 = arith.constant 0 : i32
    %c0_i32_0 = arith.constant 0 : i32
    return %arg0, %c0_i32 : i32, i32
  }
  func.func @transform_1(%arg0: i32, %arg1: i32) -> (i32, i32) {
    %c0_i32 = arith.constant 0 : i32
    return %arg0, %arg1 : i32, i32
  }
  func.func @transform_2(%arg0: i32, %arg1: i32) -> (i32, i32) {
    %c0_i32 = arith.constant 0 : i32
    %c0_i32_0 = arith.constant 0 : i32
    %c0_i32_1 = arith.constant 0 : i32
    return %c0_i32, %c0_i32_0 : i32, i32
  }
  func.func @transform_3(%arg0: i32, %arg1: i32) -> (i32, i32) {
    %c0_i32 = arith.constant 0 : i32
    %c0_i32_0 = arith.constant 0 : i32
    %c0_i32_1 = arith.constant 0 : i32
    return %c0_i32, %c0_i32_0 : i32, i32
  }
  func.func @transform_4(%arg0: i32, %arg1: i32) -> (i32, i32) {
    %c0_i32 = arith.constant 0 : i32
    %c0_i32_0 = arith.constant 0 : i32
    return %arg1, %c0_i32 : i32, i32
  }
  func.func @transform_5(%arg0: i32, %arg1: i32) -> (i32, i32) {
    %c0_i32 = arith.constant 0 : i32
    %c0_i32_0 = arith.constant 0 : i32
    %c0_i32_1 = arith.constant 0 : i32
    return %c0_i32, %c0_i32_0 : i32, i32
  }
  func.func @transform_6(%arg0: i32, %arg1: i32) -> (i32, i32) {
    %c0_i32 = arith.constant 0 : i32
    %c0_i32_0 = arith.constant 0 : i32
    %c0_i32_1 = arith.constant 0 : i32
    return %c0_i32, %c0_i32_0 : i32, i32
  }
  func.func @transform_7(%arg0: i32, %arg1: i32) -> (i32, i32) {
    %c0_i32 = arith.constant 0 : i32
    %c0_i32_0 = arith.constant 0 : i32
    %c0_i32_1 = arith.constant 0 : i32
    return %c0_i32, %c0_i32_0 : i32, i32
  }
  func.func @transform_8(%arg0: i32, %arg1: i32) -> (i32, i32) {
    %c0_i32 = arith.constant 0 : i32
    %c0_i32_0 = arith.constant 0 : i32
    %c0_i32_1 = arith.constant 0 : i32
    return %c0_i32, %c0_i32_0 : i32, i32
  }
  func.func @transform_9(%arg0: i32, %arg1: i32) -> (i32, i32) {
    %c0_i32 = arith.constant 0 : i32
    %c0_i32_0 = arith.constant 0 : i32
    %c0_i32_1 = arith.constant 0 : i32
    return %c0_i32, %c0_i32_0 : i32, i32
  }
  func.func @transform_10(%arg0: i32, %arg1: i32) -> (i32, i32) {
    %c0_i32 = arith.constant 0 : i32
    %c0_i32_0 = arith.constant 0 : i32
    %c0_i32_1 = arith.constant 0 : i32
    return %c0_i32, %c0_i32_0 : i32, i32
  }
  func.func @transform_11(%arg0: i32, %arg1: i32) -> (i32, i32) {
    %c0_i32 = arith.constant 0 : i32
    %c0_i32_0 = arith.constant 0 : i32
    return %arg0, %c0_i32 : i32, i32
  }
}

</mosaic_0001>

<bundles_post_ra>
// kernel: tpu_custom_call.1
= control target key start
LH: loop header
LB: loop body
LE: loop exit
PB: predicated region body
PF: predicated region fallthrough
CT: control target
= control target key end

     0   :  { %16 = vsyncpa [#allocation4], 0  ;;  %s1285_s0 = inlined_call_operand.hbm [shape: f32[8,128], index: 0, kind: input, shape index: {}]   ;;  %s1286_s1 = inlined_call_operand.hbm [shape: f32[8,128], index: 1, kind: input, shape index: {}]   ;;  %s1287_s2 = inlined_call_operand.hbm [shape: f32[128,128], index: 2, kind: input, shape index: {}]   ;;  %s1288_s3 = inlined_call_operand.vmem [shape: f32[1,128], index: 3, kind: input, shape index: {}]   ;;  %s1289_s4 = inlined_call_operand.hbm [shape: f32[128,128], index: 4, kind: input, shape index: {}]   ;;  %s1290_s5 = inlined_call_operand.vmem [shape: f32[1,128], index: 5, kind: input, shape index: {}]   ;;  %s1291_s6 = inlined_call_operand.hbm [shape: f32[128,128], index: 6, kind: input, shape index: {}]   ;;  %s1292_s7 = inlined_call_operand.hbm [shape: f32[128,128], index: 7, kind: input, shape index: {}]   ;;  %s1293_s8 = inlined_call_operand.vmem [shape: f32[1,128], index: 8, kind: input, shape index: {}]   ;;  %s1294_s9 = inlined_call_operand.hbm [shape: f32[128,128], index: 9, kind: input, shape index: {}]   ;;  %s1295_s10 = inlined_call_operand.vmem [shape: f32[1,128], index: 10, kind: input, shape index: {}]   ;;  %s1296_s11 = inlined_call_operand.hbm [shape: f32[8,128], index: 11, kind: output, shape index: {}]  }
   0x1   :  { %17 = vsyncpa [#allocation7], 0 }
   0x2   :  { %18 = vsyncpa [#allocation10], 0 }
   0x3   :  { %19 = vsyncpa [#allocation13], 0 }
   0x4   :  { %20 = vsyncpa [#allocation5], 0  ;;  %s1072_s17 = smov [#allocation6]  }
   0x5   :  { %s37_s18 = sshll.u32 %s1072_s17, 4  ;;  %s38_s18 = int_to_ptr.vmem [resolvable:$true] %s37_s18 }
   0x6   :  { %s910_s19 = scalar_lea.vmem %s38_s18, 128  ;;  %p915_p1 = scmp.lt.s32.totalorder %s38_s18, %s38_s18 }
   0x7   :  { %p911_p0 = scmp.ne.s32.totalorder %s38_s18, %s910_s19  ;;  %p916_p2 = scmp.lt.s32.totalorder %s910_s19, %s910_s19 }
   0x9   :  { %p917_p3 = por %p916_p2, %p915_p1 }
   0xb   :  { %p918_p4 = pnand %p917_p3, %p911_p0 }
   0xd   :  { %921 = shalt.err (!%p918_p4)
}
   0xe   :  { %40 = dma.hbm_to_vmem [thread:$0]  %s1286_s1, 128, %s38_s18, [#allocation7]  }
   0xf   :  { %s1073_s22 = smov [#allocation9]   ;;  %s1074_s24 = smov [#allocation12]  }
  0x10   :  { %s60_s23 = sshll.u32 %s1073_s22, 4  ;;  %s86_s25 = sshll.u32 %s1074_s24, 4  ;;  %s61_s23 = int_to_ptr.vmem [resolvable:$true] %s60_s23  ;;  %s87_s25 = int_to_ptr.vmem [resolvable:$true] %s86_s25 }
  0x11   :  { %s930_s26 = scalar_lea.vmem %s61_s23, 2048  ;;  %p935_p6 = scmp.lt.s32.totalorder %s61_s23, %s61_s23 }
  0x12   :  { %p931_p5 = scmp.ne.s32.totalorder %s61_s23, %s930_s26  ;;  %p936_p7 = scmp.lt.s32.totalorder %s930_s26, %s930_s26 }
  0x14   :  { %p937_p8 = por %p936_p7, %p935_p6 }
  0x16   :  { %p938_p9 = pnand %p937_p8, %p931_p5 }
  0x18   :  { %941 = shalt.err (!%p938_p9)
}
  0x19   :  { %s1075_s27 = smov 128   ;;  %s1076_s28 = smov 8  }
  0x1a   :  { %66 = dma.hbm_to_vmem [thread:$0]  %s1289_s4, 2048, %s61_s23, [#allocation10], %s1075_s27, %s1075_s27, %s1076_s28  }
  0x1b   :  { %s950_s1 = scalar_lea.vmem %s87_s25, 2048  ;;  %p955_p11 = scmp.lt.s32.totalorder %s87_s25, %s87_s25 }
  0x1c   :  { %p951_p10 = scmp.ne.s32.totalorder %s87_s25, %s950_s1  ;;  %p956_p12 = scmp.lt.s32.totalorder %s950_s1, %s950_s1 }
  0x1e   :  { %p957_p13 = por %p956_p12, %p955_p11 }
  0x20   :  { %p958_p0 = pnand %p957_p13, %p951_p10 }
  0x22   :  { %961 = shalt.err (!%p958_p0)
}
  0x23   :  { %92 = dma.hbm_to_vmem [thread:$0]  %s1292_s7, 2048, %s87_s25, [#allocation13], %s1075_s27, %s1075_s27, %s1076_s28  }
  0x24   :  { %s1077_s14 = smov [#allocation3]   ;;  %s1078_s16 = smov [#allocation8]  }
  0x25   :  { %s27_s15 = sshll.u32 %s1077_s14, 4  ;;  %s46_s4 = sshll.u32 %s1078_s16, 4  ;;  %s28_s15 = int_to_ptr.vmem [resolvable:$true] %s27_s15  ;;  %s47_s4 = int_to_ptr.vmem [resolvable:$true] %s46_s4 }
  0x26   :  { %s970_s17 = scalar_lea.vmem %s28_s15, 128  ;;  %p975_p2 = scmp.lt.s32.totalorder %s28_s15, %s28_s15 }
  0x27   :  { %p971_p1 = scmp.ne.s32.totalorder %s28_s15, %s970_s17  ;;  %p976_p3 = scmp.lt.s32.totalorder %s970_s17, %s970_s17 }
  0x29   :  { %p977_p4 = por %p976_p3, %p975_p2 }
  0x2b   :  { %p978_p5 = pnand %p977_p4, %p971_p1 }
  0x2d   :  { %981 = shalt.err (!%p978_p5)
}
  0x2e   :  { %30 = dma.hbm_to_vmem [thread:$0]  %s1285_s0, 128, %s28_s15, [#allocation4]  }
  0x2f   :  { %s990_s20 = scalar_lea.vmem %s47_s4, 2048  ;;  %p995_p7 = scmp.lt.s32.totalorder %s47_s4, %s47_s4 }
  0x30   :  { %p991_p6 = scmp.ne.s32.totalorder %s47_s4, %s990_s20  ;;  %p996_p8 = scmp.lt.s32.totalorder %s990_s20, %s990_s20 }
  0x32   :  { %p997_p9 = por %p996_p8, %p995_p7 }
  0x34   :  { %p998_p10 = pnand %p997_p9, %p991_p6 }
  0x36   :  { %1001 = shalt.err (!%p998_p10)
}
  0x37   :  { %52 = dma.hbm_to_vmem [thread:$0]  %s1287_s2, 2048, %s47_s4, [#allocation7], %s1075_s27, %s1075_s27, %s1076_s28  }
  0x38   :  { %s1079_s22 = smov [#allocation11]   ;;  %s1080_s24 = smov [#allocation14]  }
  0x39   :  { %s74_s23 = sshll.u32 %s1079_s22, 4  ;;  %s100_s0 = sshll.u32 %s1080_s24, 4  ;;  %s75_s23 = int_to_ptr.vmem [resolvable:$true] %s74_s23  ;;  %s101_s0 = int_to_ptr.vmem [resolvable:$true] %s100_s0 }
  0x3a   :  { %s1010_s25 = scalar_lea.vmem %s75_s23, 2048  ;;  %p1015_p12 = scmp.lt.s32.totalorder %s75_s23, %s75_s23 }
  0x3b   :  { %p1011_p11 = scmp.ne.s32.totalorder %s75_s23, %s1010_s25  ;;  %p1016_p13 = scmp.lt.s32.totalorder %s1010_s25, %s1010_s25 }
  0x3d   :  { %p1017_p0 = por %p1016_p13, %p1015_p12 }
  0x3f   :  { %p1018_p1 = pnand %p1017_p0, %p1011_p11 }
  0x41   :  { %1021 = shalt.err (!%p1018_p1)
}
  0x42   :  { %80 = dma.hbm_to_vmem [thread:$0]  %s1291_s6, 2048, %s75_s23, [#allocation10], %s1075_s27, %s1075_s27, %s1076_s28  }
  0x43   :  { %s1030_s2 = scalar_lea.vmem %s101_s0, 2048  ;;  %p1035_p3 = scmp.lt.s32.totalorder %s101_s0, %s101_s0 }
  0x44   :  { %p1031_p2 = scmp.ne.s32.totalorder %s101_s0, %s1030_s2  ;;  %p1036_p4 = scmp.lt.s32.totalorder %s1030_s2, %s1030_s2 }
  0x46   :  { %p1037_p5 = por %p1036_p4, %p1035_p3 }
  0x48   :  { %p1038_p6 = pnand %p1037_p5, %p1031_p2 }
  0x4a   :  { %1041 = shalt.err (!%p1038_p6)
}
  0x4b   :  { %106 = dma.hbm_to_vmem [thread:$0]  %s1294_s9, 2048, %s101_s0, [#allocation13], %s1075_s27, %s1075_s27, %s1076_s28  }
  0x4c   :  { %1062 = dma.done.wait [#allocation4], 128  }
  0x4d   :  { %1063 = vsyncadd [#allocation4], 4294967168 }
  0x4e   :  { %1064 = dma.done.wait [#allocation7], 2176  }
  0x4f   :  { %1065 = vsyncadd [#allocation7], 4294965120 }
  0x50   :  { %1066 = dma.done.wait [#allocation10], 4096  }
  0x51   :  { %1067 = vsyncadd [#allocation10], 4294963200 }
  0x52   :  { %1068 = dma.done.wait [#allocation13], 4096  }
  0x53   :  { %1069 = vsyncadd [#allocation13], 4294963200  ;;  %v1081_v0 = vmov 0.0   ;;  %vm1082_vm0 = vmmov 0   ;;  %v152_v1 = vld [vmem:[#allocation9 + $0x78] sm:$0xff]  ;;  %v151_v3 = vld [vmem:[#allocation9 + $0x70] sm:$0xff] }
  0x54   :  { %715 = vmatprep.subr.mxu0 %v1081_v0  ;;  %750 = vmatprep.subr.mxu1 %v1081_v0  ;;  %v254_v2 = vld [vmem:[#allocation8 + $0x78] sm:$0xff]  ;;  %v253_v4 = vld [vmem:[#allocation8 + $0x70] sm:$0xff]  ;;  %v150_v5 = vld [vmem:[#allocation9 + $0x68] sm:$0xff]  ;;  %s1083_s14 = smov [#allocation15]  }
  0x55   :  { %747 = vmatprep.mubr.msk.f32.mxu0 %vm1082_vm0, %v1081_v0  ;;  %782 = vmatprep.mubr.msk.f32.mxu1 %vm1082_vm0, %v1081_v0  ;;  %v252_v6 = vld [vmem:[#allocation8 + $0x68] sm:$0xff]  ;;  %v149_v7 = vld [vmem:[#allocation9 + $0x60] sm:$0xff]  ;;  %v148_v9 = vld [vmem:[#allocation9 + $0x58] sm:$0xff]  ;;  %s614_s15 = sshll.u32 %s1083_s14, 4  ;;  %s615_s15 = int_to_ptr.vmem [resolvable:$true] %s614_s15 }
  0x56   :  { %716 = vmatpush3.msra.mxu0 %v152_v1  ;;  %751 = vmatpush3.msra.mxu1 %v254_v2  ;;  %v251_v8 = vld [vmem:[#allocation8 + $0x60] sm:$0xff]  ;;  %v250_v10 = vld [vmem:[#allocation8 + $0x58] sm:$0xff]  ;;  %v147_v11 = vld [vmem:[#allocation9 + $0x50] sm:$0xff]  ;;  %s1042_s16 = scalar_lea.vmem %s615_s15, 128  ;;  %p1047_p8 = scmp.lt.s32.totalorder %s615_s15, %s615_s15 }
  0x57   :  { %717 = vmatprep.subr.mxu0 %v1081_v0  ;;  %752 = vmatprep.subr.mxu1 %v1081_v0  ;;  %v249_v12 = vld [vmem:[#allocation8 + $0x50] sm:$0xff]  ;;  %v146_v13 = vld [vmem:[#allocation9 + $0x48] sm:$0xff]  ;;  %v145_v15 = vld [vmem:[#allocation9 + $0x40] sm:$0xff]  ;;  %p1043_p7 = scmp.ne.s32.totalorder %s615_s15, %s1042_s16  ;;  %p1048_p9 = scmp.lt.s32.totalorder %s1042_s16, %s1042_s16 }
  0x58   :  { %718 = vmatpush3.msra.mxu0 %v151_v3  ;;  %753 = vmatpush3.msra.mxu1 %v253_v4  ;;  %v248_v14 = vld [vmem:[#allocation8 + $0x48] sm:$0xff]  ;;  %v247_v16 = vld [vmem:[#allocation8 + $0x40] sm:$0xff]  ;;  %v144_v17 = vld [vmem:[#allocation9 + $0x38] sm:$0xff] }
  0x59   :  { %719 = vmatprep.subr.mxu0 %v1081_v0  ;;  %754 = vmatprep.subr.mxu1 %v1081_v0  ;;  %v246_v18 = vld [vmem:[#allocation8 + $0x38] sm:$0xff]  ;;  %v143_v19 = vld [vmem:[#allocation9 + $0x30] sm:$0xff]  ;;  %v142_v21 = vld [vmem:[#allocation9 + $0x28] sm:$0xff]  ;;  %p1049_p10 = por %p1048_p9, %p1047_p8 }
  0x5a   :  { %720 = vmatpush3.msra.mxu0 %v150_v5  ;;  %755 = vmatpush3.msra.mxu1 %v252_v6  ;;  %v245_v20 = vld [vmem:[#allocation8 + $0x30] sm:$0xff]  ;;  %v244_v22 = vld [vmem:[#allocation8 + $0x28] sm:$0xff]  ;;  %v141_v23 = vld [vmem:[#allocation9 + $0x20] sm:$0xff] }
  0x5b   :  { %721 = vmatprep.subr.mxu0 %v1081_v0  ;;  %756 = vmatprep.subr.mxu1 %v1081_v0  ;;  %v243_v24 = vld [vmem:[#allocation8 + $0x20] sm:$0xff]  ;;  %v140_v25 = vld [vmem:[#allocation9 + $0x18] sm:$0xff]  ;;  %v139_v27 = vld [vmem:[#allocation9 + $0x10] sm:$0xff]  ;;  %p1050_p11 = pnand %p1049_p10, %p1043_p7 }
  0x5c   :  { %722 = vmatpush3.msra.mxu0 %v149_v7  ;;  %757 = vmatpush3.msra.mxu1 %v251_v8  ;;  %v242_v26 = vld [vmem:[#allocation8 + $0x18] sm:$0xff]  ;;  %v241_v28 = vld [vmem:[#allocation8 + $0x10] sm:$0xff]  ;;  %v138_v29 = vld [vmem:[#allocation9 + $0x8] sm:$0xff] }
  0x5d   :  { %723 = vmatprep.subr.mxu0 %v1081_v0  ;;  %758 = vmatprep.subr.mxu1 %v1081_v0  ;;  %v240_v30 = vld [vmem:[#allocation8 + $0x8] sm:$0xff]  ;;  %v137_v31 = vld [vmem:[#allocation9] sm:$0xff]  ;;  %v136_v33 = vld [vmem:[#allocation6] sm:$0xff] }
  0x5e   :  { %724 = vmatpush3.msra.mxu0 %v148_v9  ;;  %759 = vmatpush3.msra.mxu1 %v250_v10  ;;  %v239_v32 = vld [vmem:[#allocation8] sm:$0xff]  ;;  %v238_v34 = vld [vmem:[#allocation3] sm:$0xff]  ;;  %v364_v35 = vld [vmem:[#allocation12 + $0x78] sm:$0xff] }
  0x5f   :  { %725 = vmatprep.subr.mxu0 %v1081_v0  ;;  %760 = vmatprep.subr.mxu1 %v1081_v0  ;;  %v348_v36 = vld [vmem:[#allocation11 + $0x78] sm:$0xff]  ;;  %v363_v37 = vld [vmem:[#allocation12 + $0x70] sm:$0xff]  ;;  %v362_v39 = vld [vmem:[#allocation12 + $0x68] sm:$0xff] }
  0x60   :  { %726 = vmatpush3.msra.mxu0 %v147_v11  ;;  %761 = vmatpush3.msra.mxu1 %v249_v12  ;;  %v347_v38 = vld [vmem:[#allocation11 + $0x70] sm:$0xff]  ;;  %v346_v40 = vld [vmem:[#allocation11 + $0x68] sm:$0xff]  ;;  %v361_v41 = vld [vmem:[#allocation12 + $0x60] sm:$0xff] }
  0x61   :  { %727 = vmatprep.subr.mxu0 %v1081_v0  ;;  %762 = vmatprep.subr.mxu1 %v1081_v0  ;;  %v345_v42 = vld [vmem:[#allocation11 + $0x60] sm:$0xff]  ;;  %v360_v43 = vld [vmem:[#allocation12 + $0x58] sm:$0xff]  ;;  %v359_v45 = vld [vmem:[#allocation12 + $0x50] sm:$0xff] }
  0x62   :  { %728 = vmatpush3.msra.mxu0 %v146_v13  ;;  %763 = vmatpush3.msra.mxu1 %v248_v14  ;;  %v344_v44 = vld [vmem:[#allocation11 + $0x58] sm:$0xff]  ;;  %v343_v46 = vld [vmem:[#allocation11 + $0x50] sm:$0xff]  ;;  %v358_v47 = vld [vmem:[#allocation12 + $0x48] sm:$0xff] }
  0x63   :  { %729 = vmatprep.subr.mxu0 %v1081_v0  ;;  %764 = vmatprep.subr.mxu1 %v1081_v0  ;;  %v342_v48 = vld [vmem:[#allocation11 + $0x48] sm:$0xff]  ;;  %v357_v49 = vld [vmem:[#allocation12 + $0x40] sm:$0xff]  ;;  %v356_v51 = vld [vmem:[#allocation12 + $0x38] sm:$0xff] }
  0x64   :  { %730 = vmatpush3.msra.mxu0 %v145_v15  ;;  %765 = vmatpush3.msra.mxu1 %v247_v16  ;;  %v341_v50 = vld [vmem:[#allocation11 + $0x40] sm:$0xff]  ;;  %v340_v52 = vld [vmem:[#allocation11 + $0x38] sm:$0xff]  ;;  %v355_v53 = vld [vmem:[#allocation12 + $0x30] sm:$0xff] }
  0x65   :  { %731 = vmatprep.subr.mxu0 %v1081_v0  ;;  %766 = vmatprep.subr.mxu1 %v1081_v0  ;;  %v339_v54 = vld [vmem:[#allocation11 + $0x30] sm:$0xff]  ;;  %v354_v55 = vld [vmem:[#allocation12 + $0x28] sm:$0xff]  ;;  %v353_v57 = vld [vmem:[#allocation12 + $0x20] sm:$0xff] }
  0x66   :  { %732 = vmatpush3.msra.mxu0 %v144_v17  ;;  %767 = vmatpush3.msra.mxu1 %v246_v18  ;;  %v338_v56 = vld [vmem:[#allocation11 + $0x28] sm:$0xff]  ;;  %v337_v58 = vld [vmem:[#allocation11 + $0x20] sm:$0xff]  ;;  %v352_v59 = vld [vmem:[#allocation12 + $0x18] sm:$0xff] }
  0x67   :  { %733 = vmatprep.subr.mxu0 %v1081_v0  ;;  %768 = vmatprep.subr.mxu1 %v1081_v0  ;;  %v336_v60 = vld [vmem:[#allocation11 + $0x18] sm:$0xff]  ;;  %v351_v61 = vld [vmem:[#allocation12 + $0x10] sm:$0xff]  ;;  %v350_v63 = vld [vmem:[#allocation12 + $0x8] sm:$0xff] }
  0x68   :  { %734 = vmatpush3.msra.mxu0 %v143_v19  ;;  %769 = vmatpush3.msra.mxu1 %v245_v20  ;;  %v335_v62 = vld [vmem:[#allocation11 + $0x10] sm:$0xff]  ;;  %v334_v1 = vld [vmem:[#allocation11 + $0x8] sm:$0xff]  ;;  %v349_v2 = vld [vmem:[#allocation12] sm:$0xff] }
  0x69   :  { %735 = vmatprep.subr.mxu0 %v1081_v0  ;;  %770 = vmatprep.subr.mxu1 %v1081_v0  ;;  %v333_v3 = vld [vmem:[#allocation11] sm:$0xff]  ;;  %v626_v4 = vld [vmem:[%s1290_s5] ss:$0 sm:$0xff]  ;;  %v529_v14 = vld [vmem:[#allocation14 + $0x78] sm:$0xff] }
  0x6a   :  { %736 = vmatpush3.msra.mxu0 %v142_v21  ;;  %771 = vmatpush3.msra.mxu1 %v244_v22  ;;  %v627_v5 = vld [vmem:[%s1288_s3] ss:$0 sm:$0xff]  ;;  %v527_v16 = vld [vmem:[#allocation14 + $0x68] sm:$0xff]  ;;  %v526_v17 = vld [vmem:[#allocation14 + $0x60] sm:$0xff] }
  0x6b   :  { %737 = vmatprep.subr.mxu0 %v1081_v0  ;;  %772 = vmatprep.subr.mxu1 %v1081_v0  ;;  %v528_v15 = vld [vmem:[#allocation14 + $0x70] sm:$0xff]  ;;  %v525_v18 = vld [vmem:[#allocation14 + $0x58] sm:$0xff]  ;;  %v523_v20 = vld [vmem:[#allocation14 + $0x48] sm:$0xff] }
  0x6c   :  { %738 = vmatpush3.msra.mxu0 %v141_v23  ;;  %773 = vmatpush3.msra.mxu1 %v243_v24  ;;  %v524_v19 = vld [vmem:[#allocation14 + $0x50] sm:$0xff]  ;;  %v522_v21 = vld [vmem:[#allocation14 + $0x40] sm:$0xff]  ;;  %v521_v22 = vld [vmem:[#allocation14 + $0x38] sm:$0xff] }
  0x6d   :  { %739 = vmatprep.subr.mxu0 %v1081_v0  ;;  %774 = vmatprep.subr.mxu1 %v1081_v0  ;;  %v520_v23 = vld [vmem:[#allocation14 + $0x30] sm:$0xff]  ;;  %v519_v24 = vld [vmem:[#allocation14 + $0x28] sm:$0xff] }
  0x6e   :  { %740 = vmatpush3.msra.mxu0 %v140_v25  ;;  %775 = vmatpush3.msra.mxu1 %v242_v26  ;;  %v518_v25 = vld [vmem:[#allocation14 + $0x20] sm:$0xff]  ;;  %v517_v26 = vld [vmem:[#allocation14 + $0x18] sm:$0xff] }
  0x6f   :  { %741 = vmatprep.subr.mxu0 %v1081_v0  ;;  %776 = vmatprep.subr.mxu1 %v1081_v0 }
  0x70   :  { %742 = vmatpush3.msra.mxu0 %v139_v27  ;;  %777 = vmatpush3.msra.mxu1 %v241_v28  ;;  %v516_v27 = vld [vmem:[#allocation14 + $0x10] sm:$0xff]  ;;  %v515_v28 = vld [vmem:[#allocation14 + $0x8] sm:$0xff] }
  0x71   :  { %743 = vmatprep.subr.mxu0 %v1081_v0  ;;  %778 = vmatprep.subr.mxu1 %v1081_v0 }
  0x72   :  { %744 = vmatpush3.msra.mxu0 %v138_v29  ;;  %779 = vmatpush3.msra.mxu1 %v240_v30  ;;  %v514_v29 = vld [vmem:[#allocation14] sm:$0xff] }
  0x73   :  { %745 = vmatprep.subr.mxu0 %v1081_v0  ;;  %780 = vmatprep.subr.mxu1 %v1081_v0 }
  0x74   :  { %746 = vmatpush3.msra.mxu0 %v137_v31  ;;  %781 = vmatpush3.msra.mxu1 %v239_v32  ;;  %v628_v32 = vld [vmem:[%s1293_s8] ss:$0 sm:$0xff] }
  0x75   :  { %748 = vmatmul.mubr.f32.vlgmr.msra.gmra.mxu0 %v136_v33  ;;  %783 = vmatmul.mubr.f32.vlgmr.msra.gmra.mxu1 %v238_v34 }
  0x76   :  { %785 = vmatprep.subr.mxu0 %v1081_v0  ;;  %820 = vmatprep.subr.mxu1 %v1081_v0 }
  0x77   :  { %786 = vmatpush3.msra.mxu0 %v364_v35  ;;  %821 = vmatpush3.msra.mxu1 %v348_v36 }
  0x78   :  { %787 = vmatprep.subr.mxu0 %v1081_v0  ;;  %822 = vmatprep.subr.mxu1 %v1081_v0 }
  0x79   :  { %788 = vmatpush3.msra.mxu0 %v363_v37  ;;  %823 = vmatpush3.msra.mxu1 %v347_v38  ;;  %v629_v38 = vld [vmem:[%s1295_s10] ss:$0 sm:$0xff] }
  0x7a   :  { %789 = vmatprep.subr.mxu0 %v1081_v0  ;;  %824 = vmatprep.subr.mxu1 %v1081_v0 }
  0x7b   :  { %790 = vmatpush3.msra.mxu0 %v362_v39  ;;  %825 = vmatpush3.msra.mxu1 %v346_v40 }
  0x7c   :  { %791 = vmatprep.subr.mxu0 %v1081_v0  ;;  %826 = vmatprep.subr.mxu1 %v1081_v0 }
  0x7d   :  { %792 = vmatpush3.msra.mxu0 %v361_v41  ;;  %827 = vmatpush3.msra.mxu1 %v345_v42 }
  0x7e   :  { %793 = vmatprep.subr.mxu0 %v1081_v0  ;;  %828 = vmatprep.subr.mxu1 %v1081_v0 }
  0x7f   :  { %794 = vmatpush3.msra.mxu0 %v360_v43  ;;  %829 = vmatpush3.msra.mxu1 %v344_v44 }
  0x80   :  { %795 = vmatprep.subr.mxu0 %v1081_v0  ;;  %830 = vmatprep.subr.mxu1 %v1081_v0 }
  0x81   :  { %796 = vmatpush3.msra.mxu0 %v359_v45  ;;  %831 = vmatpush3.msra.mxu1 %v343_v46 }
  0x82   :  { %797 = vmatprep.subr.mxu0 %v1081_v0  ;;  %832 = vmatprep.subr.mxu1 %v1081_v0 }
  0x83   :  { %798 = vmatpush3.msra.mxu0 %v358_v47  ;;  %833 = vmatpush3.msra.mxu1 %v342_v48 }
  0x84   :  { %799 = vmatprep.subr.mxu0 %v1081_v0  ;;  %834 = vmatprep.subr.mxu1 %v1081_v0 }
  0x85   :  { %800 = vmatpush3.msra.mxu0 %v357_v49  ;;  %835 = vmatpush3.msra.mxu1 %v341_v50 }
  0x86   :  { %801 = vmatprep.subr.mxu0 %v1081_v0  ;;  %836 = vmatprep.subr.mxu1 %v1081_v0 }
  0x87   :  { %802 = vmatpush3.msra.mxu0 %v356_v51  ;;  %837 = vmatpush3.msra.mxu1 %v340_v52 }
  0x88   :  { %803 = vmatprep.subr.mxu0 %v1081_v0  ;;  %838 = vmatprep.subr.mxu1 %v1081_v0 }
  0x89   :  { %804 = vmatpush3.msra.mxu0 %v355_v53  ;;  %839 = vmatpush3.msra.mxu1 %v339_v54 }
  0x8a   :  { %805 = vmatprep.subr.mxu0 %v1081_v0  ;;  %840 = vmatprep.subr.mxu1 %v1081_v0 }
  0x8b   :  { %806 = vmatpush3.msra.mxu0 %v354_v55  ;;  %841 = vmatpush3.msra.mxu1 %v338_v56 }
  0x8c   :  { %807 = vmatprep.subr.mxu0 %v1081_v0  ;;  %842 = vmatprep.subr.mxu1 %v1081_v0 }
  0x8d   :  { %808 = vmatpush3.msra.mxu0 %v353_v57  ;;  %843 = vmatpush3.msra.mxu1 %v337_v58 }
  0x8e   :  { %809 = vmatprep.subr.mxu0 %v1081_v0  ;;  %844 = vmatprep.subr.mxu1 %v1081_v0 }
  0x8f   :  { %810 = vmatpush3.msra.mxu0 %v352_v59  ;;  %845 = vmatpush3.msra.mxu1 %v336_v60 }
  0x90   :  { %811 = vmatprep.subr.mxu0 %v1081_v0  ;;  %846 = vmatprep.subr.mxu1 %v1081_v0 }
  0x91   :  { %817 = vmatprep.mubr.msk.f32.mxu0 %vm1082_vm0, %v1081_v0  ;;  %852 = vmatprep.mubr.msk.f32.mxu1 %vm1082_vm0, %v1081_v0 }
  0x92   :  { %812 = vmatpush3.msra.mxu0 %v351_v61  ;;  %847 = vmatpush3.msra.mxu1 %v335_v62 }
  0x93   :  { %813 = vmatprep.subr.mxu0 %v1081_v0  ;;  %848 = vmatprep.subr.mxu1 %v1081_v0 }
  0x94   :  { %814 = vmatpush3.msra.mxu0 %v350_v63  ;;  %849 = vmatpush3.msra.mxu1 %v334_v1 }
  0x95   :  { %815 = vmatprep.subr.mxu0 %v1081_v0  ;;  %850 = vmatprep.subr.mxu1 %v1081_v0 }
  0x96   :  { %816 = vmatpush3.msra.mxu0 %v349_v2  ;;  %851 = vmatpush3.msra.mxu1 %v333_v3 }
  0x97   :  { %855 = vmatprep.subr.mxu0 %v1081_v0 }
 0x135   :  { %v219_v6 = vpop.f32.mrf.mxu0  ;;  %v328_v7 = vpop.f32.mrf.mxu1 }
 0x136   :  { %v236_v8 = vadd.f32 %v626_v4, %v219_v6  ;;  %v329_v9 = vadd.f32 %v627_v5, %v328_v7 }
 0x137   :  { %v749_v10 = vpop.f32.mrf.mxu0  ;;  %v784_v11 = vpop.f32.mrf.mxu1 }
 0x138   :  { %v237_v12 = vmax.f32 %v236_v8, 0.0  ;;  %v332_v13 = vmax.f32 %v329_v9, 0.0 }
 0x13a   :  { %818 = vmatmul.mubr.f32.vlgmr.msra.gmra.mxu0 %v332_v13  ;;  %853 = vmatmul.mubr.f32.vlgmr.msra.gmra.mxu1 %v237_v12 }
 0x13b   :  { %856 = vmatpush3.msra.mxu0 %v529_v14  ;;  %887 = vmatprep.mubr.msk.f32.mxu0 %vm1082_vm0, %v1081_v0 }
 0x13c   :  { %857 = vmatprep.subr.mxu0 %v1081_v0 }
 0x13d   :  { %858 = vmatpush3.msra.mxu0 %v528_v15 }
 0x13e   :  { %859 = vmatprep.subr.mxu0 %v1081_v0 }
 0x13f   :  { %860 = vmatpush3.msra.mxu0 %v527_v16 }
 0x140   :  { %861 = vmatprep.subr.mxu0 %v1081_v0 }
 0x141   :  { %862 = vmatpush3.msra.mxu0 %v526_v17 }
 0x142   :  { %863 = vmatprep.subr.mxu0 %v1081_v0 }
 0x143   :  { %864 = vmatpush3.msra.mxu0 %v525_v18 }
 0x144   :  { %865 = vmatprep.subr.mxu0 %v1081_v0 }
 0x145   :  { %866 = vmatpush3.msra.mxu0 %v524_v19 }
 0x146   :  { %867 = vmatprep.subr.mxu0 %v1081_v0 }
 0x147   :  { %868 = vmatpush3.msra.mxu0 %v523_v20 }
 0x148   :  { %869 = vmatprep.subr.mxu0 %v1081_v0 }
 0x149   :  { %870 = vmatpush3.msra.mxu0 %v522_v21 }
 0x14a   :  { %871 = vmatprep.subr.mxu0 %v1081_v0 }
 0x14b   :  { %872 = vmatpush3.msra.mxu0 %v521_v22 }
 0x14c   :  { %873 = vmatprep.subr.mxu0 %v1081_v0 }
 0x14d   :  { %874 = vmatpush3.msra.mxu0 %v520_v23 }
 0x14e   :  { %875 = vmatprep.subr.mxu0 %v1081_v0 }
 0x14f   :  { %876 = vmatpush3.msra.mxu0 %v519_v24 }
 0x150   :  { %877 = vmatprep.subr.mxu0 %v1081_v0 }
 0x151   :  { %878 = vmatpush3.msra.mxu0 %v518_v25 }
 0x152   :  { %879 = vmatprep.subr.mxu0 %v1081_v0 }
 0x153   :  { %880 = vmatpush3.msra.mxu0 %v517_v26 }
 0x154   :  { %881 = vmatprep.subr.mxu0 %v1081_v0 }
 0x155   :  { %882 = vmatpush3.msra.mxu0 %v516_v27 }
 0x156   :  { %883 = vmatprep.subr.mxu0 %v1081_v0 }
 0x157   :  { %884 = vmatpush3.msra.mxu0 %v515_v28 }
 0x158   :  { %885 = vmatprep.subr.mxu0 %v1081_v0 }
 0x159   :  { %886 = vmatpush3.msra.mxu0 %v514_v29 }
 0x1fa   :  { %v431_v30 = vpop.f32.mrf.mxu0  ;;  %v501_v31 = vpop.f32.mrf.mxu1 }
 0x1fb   :  { %v502_v33 = vadd.f32 %v501_v31, %v431_v30 }
 0x1fc   :  { %v819_v34 = vpop.f32.mrf.mxu0  ;;  %v854_v35 = vpop.f32.mrf.mxu1 }
 0x1fd   :  { %v512_v36 = vadd.f32 %v628_v32, %v502_v33 }
 0x1ff   :  { %v513_v37 = vmax.f32 %v512_v36, 0.0 }
 0x201   :  { %888 = vmatmul.mubr.f32.vlgmr.msra.gmra.mxu0 %v513_v37 }
 0x2c1   :  { %v603_v0 = vpop.f32.mrf.mxu0 }
 0x2c2   :  { %v604_v39 = vadd.f32 %v629_v38, %v603_v0 }
 0x2c3   :  { %v889_v40 = vpop.f32.mrf.mxu0 }
 0x2c4   :  { %607 = vst [vmem:[#allocation15] sm:$0xff] %v604_v39 }
 0x2c5   :  { %1053 = shalt.err (!%p1050_p11)
}
 0x2c6   :  { %617 = dma.vmem_to_hbm [thread:$0]  %s615_s15, 128, %s1296_s11, [#allocation5]  }
 0x2c7   :  { %1070 = dma.done.wait [#allocation5], 128  }
 0x2c8   :  { %1071 = vsyncadd [#allocation5], 4294967168 }
 0x2c9   :  { %621 = vsyncpa [#allocation4], 1 }
 0x2ca   :  { %622 = vsyncpa [#allocation7], 1 }
 0x2cb   :  { %623 = vsyncpa [#allocation10], 1 }
 0x2cc   :  { %624 = vsyncpa [#allocation13], 1 }
 0x2cd   :  { %625 = vsyncpa [#allocation5], 1 }

</bundles_post_ra>
